<compile_context>
chip_gen: v7x
topology: tpu7x:2x2x1
jax: 0.10.0
libtpu: 0.0.40
codegen_flags: <defaults>
</compile_context>

<pallas_src>
import functools

import jax
import jax.numpy as jnp
from jax.experimental import pallas as pl
from jax.experimental.pallas import tpu as pltpu


# ---------------------------------------------------------------------------
# Small helpers
# ---------------------------------------------------------------------------
def _round_up(n, m):
    return ((n + m - 1) // m) * m


def _round_down(n, m):
    return (n // m) * m


def _pad2d(a, rows, cols):
    pr, pc = rows - a.shape[0], cols - a.shape[1]
    if pr == 0 and pc == 0:
        return a
    return jnp.pad(a, ((0, pr), (0, pc)))


def _vmem_budgets():
    """Generation-aware budgets: (tile_budget_bytes, vmem_limit_bytes, multi_core)."""
    try:
        cap = int(pltpu.get_tpu_info().vmem_capacity_bytes)
    except Exception:
        cap = 64 << 20                      # conservative: assume smallest part
    if cap >= (100 << 20):                  # v5e / v6e: 128 MiB per TensorCore
        return 88 << 20, 104 << 20, False
    return 20 << 20, 48 << 20, True         # v7x-like: 64 MiB VMEM, 2 TCs/chip


# ---------------------------------------------------------------------------
# Kernels
# ---------------------------------------------------------------------------
def _audio_resident_kernel(x_ref, y_ref, wx_ref, bx_ref, wy_ref, by_ref,
                           wo_ref, bo_ref, out_ref, *, x_gate: bool):
    cdt = wx_ref.dtype
    # Both MXU pushes issued back-to-back; casts are cheap VPU work hidden
    # under the matmuls.  Accumulation / bias / gate math stay f32.
    xw = jnp.dot(x_ref[...].astype(cdt), wx_ref[...],
                 preferred_element_type=jnp.float32)
    yw = jnp.dot(y_ref[...].astype(cdt), wy_ref[...],
                 preferred_element_type=jnp.float32)
    out_x = xw + bx_ref[...]
    out_y = yw + by_ref[...]
    if x_gate:
        h = jax.nn.sigmoid(out_x) * out_y
    else:
        h = out_x * jax.nn.sigmoid(out_y)
    out = jnp.dot(h.astype(cdt), wo_ref[...],
                  preferred_element_type=jnp.float32) + bo_ref[...]
    out_ref[...] = out.astype(out_ref.dtype)


def _audio_dimtiled_kernel(x_ref, y_ref, wx_ref, bx_ref, wy_ref, by_ref,
                           wo_ref, bo_ref, out_ref, acc_ref, *, x_gate: bool):
    # Streams weights over the hidden dim (grid axis 1), f32 accumulator.
    k = pl.program_id(1)

    @pl.when(k == 0)
    def _():
        acc_ref[...] = jnp.zeros_like(acc_ref)

    cdt = wx_ref.dtype
    out_x = jnp.dot(x_ref[...].astype(cdt), wx_ref[...],
                    preferred_element_type=jnp.float32) + bx_ref[...]
    out_y = jnp.dot(y_ref[...].astype(cdt), wy_ref[...],
                    preferred_element_type=jnp.float32) + by_ref[...]
    if x_gate:
        h = jax.nn.sigmoid(out_x) * out_y
    else:
        h = out_x * jax.nn.sigmoid(out_y)
    acc_ref[...] += jnp.dot(h.astype(cdt), wo_ref[...],
                            preferred_element_type=jnp.float32)

    @pl.when(k == pl.num_programs(1) - 1)
    def _():
        out_ref[...] = (acc_ref[...] + bo_ref[...]).astype(out_ref.dtype)


def _fused_kernel(x_ref, w_ref, b_ref, out_ref):
    # no-audio path: fc_out(fc_x(x)) pre-folded into one matmul in prepare_params.
    out = jnp.dot(x_ref[...].astype(w_ref.dtype), w_ref[...],
                  preferred_element_type=jnp.float32) + b_ref[...]
    out_ref[...] = out.astype(out_ref.dtype)


# ---------------------------------------------------------------------------
# One-time parameter preparation (pad / cast / fold)
# ---------------------------------------------------------------------------
def prepare_params(params, *, compute_dtype=jnp.bfloat16):
    """Pad weights to lane-dense (128-multiple) shapes, cast to the MXU dtype,
    and pre-fold the no-audio path.  Run once per parameter set."""
    cdt = jnp.dtype(compute_dtype)
    f32 = jnp.float32
    input_dim, dim = params["wx"].shape
    output_dim = params["wo"].shape[1]
    in_p = _round_up(input_dim, 128)
    dim_p = _round_up(dim, 128)
    out_p = _round_up(output_dim, 128)

    wx = _pad2d(params["wx"].astype(cdt), in_p, dim_p)
    wy = _pad2d(params["wy"].astype(cdt), in_p, dim_p)
    wo = _pad2d(params["wo"].astype(cdt), dim_p, out_p)
    bx = _pad2d(params["bx"].reshape(1, -1).astype(f32), 1, dim_p)
    by = _pad2d(params["by"].reshape(1, -1).astype(f32), 1, dim_p)
    bo = _pad2d(params["bo"].reshape(1, -1).astype(f32), 1, out_p)

    # no-audio fold (exact up to f32 reassociation; no nonlinearity in between).
    w_f32 = params["wx"].astype(f32) @ params["wo"].astype(f32)
    b_f32 = params["bx"].reshape(1, -1).astype(f32) @ params["wo"].astype(f32) \
        + params["bo"].reshape(1, -1).astype(f32)
    w_fused = _pad2d(w_f32.astype(cdt), in_p, out_p)
    b_fused = _pad2d(b_f32, 1, out_p)

    prepared = dict(wx=wx, bx=bx, wy=wy, by=by, wo=wo, bo=bo,
                    w_fused=w_fused, b_fused=b_fused,
                    input_dim=input_dim, dim=dim, output_dim=output_dim,
                    in_p=in_p, dim_p=dim_p, out_p=out_p, compute_dtype=cdt)
    return jax.tree_util.tree_map(
        lambda a: jax.block_until_ready(a) if isinstance(a, jax.Array) else a,
        prepared)


# ---------------------------------------------------------------------------
# Forward wrapper
# ---------------------------------------------------------------------------
def gated_fusion_forward(prepared, x, y=None, *, use_audio=False, x_gate=True,
                         force_dim_tiling=False):
    """Pallas implementation of GatedFusion.forward on prepared params."""
    B, input_dim = x.shape
    assert input_dim == prepared["input_dim"]
    in_p, dim_p, out_p = prepared["in_p"], prepared["dim_p"], prepared["out_p"]
    output_dim = prepared["output_dim"]
    cdt = prepared["compute_dtype"]
    out_dtype = x.dtype
    x_it = jnp.dtype(x.dtype).itemsize
    out_it = jnp.dtype(out_dtype).itemsize
    w_it = jnp.dtype(cdt).itemsize

    tile_budget, vmem_limit, multi_core = _vmem_budgets()
    min_tb = 16 if w_it < 4 else 8           # bf16 packs 2 rows/sublane
    b_pad0 = _round_up(B, min_tb)
    tb_candidates = (2048, 1024, 512, 256, 128, 64, 32, 16, 8)

    if use_audio:
        weight_bytes = (2 * in_p * dim_p + dim_p * out_p) * w_it \
            + (2 * dim_p + out_p) * 4
        per_row = (2 * 2 * in_p * x_it            # x, y tiles (double-buffered)
                   + 2 * out_p * out_it           # out tile (double-buffered)
                   + 5 * dim_p * 4 + dim_p * w_it)  # f32 intermediates + h cast
        dim_tiled = force_dim_tiling or weight_bytes > 0.45 * tile_budget
    else:
        weight_bytes = in_p * out_p * w_it + out_p * 4
        per_row = 2 * in_p * x_it + 2 * out_p * out_it + out_p * 4
        dim_tiled = False

    def _pick_tb(fixed_bytes):
        for cand in tb_candidates:
            if cand < min_tb or cand > max(b_pad0, min_tb):
                continue
            if fixed_bytes + cand * per_row <= tile_budget:
                return cand
        return None

    tb = td = None
    if not dim_tiled:
        tb = _pick_tb(weight_bytes)
        if tb is None:
            if use_audio:
                dim_tiled = True
            else:
                # TODO(synk): stream the fused weight over input_dim if it ever
                # outgrows VMEM; for classification-sized output_dim it fits.
                tb = min_tb

    if use_audio and dim_tiled:
        for cand_tb in tb_candidates:
            if cand_tb < min_tb or cand_tb > max(b_pad0, min_tb):
                continue
            for cand_td in (2048, 1024, 512, 256, 128):
                if cand_td > dim_p:
                    continue
                chunk_w = 2 * (2 * in_p * cand_td + cand_td * out_p) * w_it \
                    + 2 * (2 * cand_td + out_p) * 4
                rows = (2 * 2 * in_p * x_it + 2 * out_p * out_it + out_p * 4
                        + 5 * cand_td * 4 + cand_td * w_it)
                if chunk_w + cand_tb * rows <= tile_budget:
                    tb, td = cand_tb, cand_td
                    break
            if tb is not None:
                break
        if tb is None:
            tb, td = min_tb, 128

    # On 2-TensorCore parts, make sure there are >= 2 grid steps to shard.
    if multi_core and b_pad0 >= 2 * min_tb and _round_up(B, tb) // tb < 2:
        tb = max(min_tb, _round_down(max(b_pad0 // 2, min_tb), min_tb))

    b_pad = _round_up(B, tb)
    nb = b_pad // tb

    # Activations: pad only if needed (no wrapper-side dtype cast — the cast to
    # the MXU dtype happens inside the kernel).
    xp = _pad2d(x, b_pad, in_p)
    yp = _pad2d(y, b_pad, in_p) if use_audio else None

    wx, bx = prepared["wx"], prepared["bx"]
    wy, by = prepared["wy"], prepared["by"]
    wo, bo = prepared["wo"], prepared["bo"]
    w_fused, b_fused = prepared["w_fused"], prepared["b_fused"]

    def _run(single_buffer_weights):
        def res_spec(a):
            idx = lambda *_: (0,) * a.ndim            # noqa: E731
            if single_buffer_weights:
                return pl.BlockSpec(a.shape, idx, pipeline_mode=pl.Buffered(1))
            return pl.BlockSpec(a.shape, idx)

        if use_audio and dim_tiled:
            nk = dim_p // td
            grid = (nb, nk)
            kernel = functools.partial(_audio_dimtiled_kernel, x_gate=x_gate)
            args = (xp, yp, wx, bx, wy, by, wo, bo)
            in_specs = [
                pl.BlockSpec((tb, in_p), lambda i, k: (i, 0)),
                pl.BlockSpec((tb, in_p), lambda i, k: (i, 0)),
                pl.BlockSpec((in_p, td), lambda i, k: (0, k)),
                pl.BlockSpec((1, td), lambda i, k: (0, k)),
                pl.BlockSpec((in_p, td), lambda i, k: (0, k)),
                pl.BlockSpec((1, td), lambda i, k: (0, k)),
                pl.BlockSpec((td, out_p), lambda i, k: (k, 0)),
                res_spec(bo),
            ]
            out_specs = pl.BlockSpec((tb, out_p), lambda i, k: (i, 0))
            scratch = [pltpu.VMEM((tb, out_p), jnp.float32)]
            dims = ("parallel", "arbitrary")
            flops = 2 * b_pad * (2 * in_p * dim_p + dim_p * out_p)
            trans = b_pad * dim_p
        elif use_audio:
            grid = (nb,)
            kernel = functools.partial(_audio_resident_kernel, x_gate=x_gate)
            args = (xp, yp, wx, bx, wy, by, wo, bo)
            in_specs = [
                pl.BlockSpec((tb, in_p), lambda i: (i, 0)),
                pl.BlockSpec((tb, in_p), lambda i: (i, 0)),
                res_spec(wx), res_spec(bx), res_spec(wy), res_spec(by),
                res_spec(wo), res_spec(bo),
            ]
            out_specs = pl.BlockSpec((tb, out_p), lambda i: (i, 0))
            scratch = []
            dims = ("parallel",)
            flops = 2 * b_pad * (2 * in_p * dim_p + dim_p * out_p)
            trans = b_pad * dim_p
        else:
            grid = (nb,)
            kernel = _fused_kernel
            args = (xp, w_fused, b_fused)
            in_specs = [pl.BlockSpec((tb, in_p), lambda i: (i, 0)),
                        res_spec(w_fused), res_spec(b_fused)]
            out_specs = pl.BlockSpec((tb, out_p), lambda i: (i, 0))
            scratch = []
            dims = ("parallel",)
            flops = 2 * b_pad * in_p * out_p
            trans = 0

        bytes_accessed = sum(int(a.size) * a.dtype.itemsize for a in args) \
            + b_pad * out_p * out_it

        return pl.pallas_call(
            kernel,
            out_shape=jax.ShapeDtypeStruct((b_pad, out_p), out_dtype),
            grid=grid,
            in_specs=in_specs,
            out_specs=out_specs,
            scratch_shapes=scratch,
            compiler_params=pltpu.CompilerParams(
                dimension_semantics=dims,
                vmem_limit_bytes=int(vmem_limit)),
            cost_estimate=pl.CostEstimate(
                flops=int(flops),
                transcendentals=int(trans),
                bytes_accessed=int(bytes_accessed)),
        )(*args)

    try:
        out_padded = _run(True)       # single-buffered resident weights
    except Exception:
        out_padded = _run(False)      # fall back to default double buffering

    return out_padded[:B, :output_dim]


# ---------------------------------------------------------------------------
# Deterministic parameter init (PyTorch nn.Linear-style uniform bounds)
# ---------------------------------------------------------------------------
def init_params(key, input_dim, dim, output_dim, dtype=jnp.float32):
    ks = jax.random.split(key, 6)

    def linear(kw, kb, fan_in, fan_out):
        bound = 1.0 / jnp.sqrt(fan_in)
        # stored as [in, out] (transpose of PyTorch's [out, in])
        w = jax.random.uniform(kw, (fan_in, fan_out), dtype, -bound, bound)
        b = jax.random.uniform(kb, (fan_out,), dtype, -bound, bound)
        return w, b

    wx, bx = linear(ks[0], ks[1], input_dim, dim)
    wy, by = linear(ks[2], ks[3], input_dim, dim)
    wo, bo = linear(ks[4], ks[5], dim, output_dim)
    return dict(wx=wx, bx=bx, wy=wy, by=by, wo=wo, bo=bo)


# ---------------------------------------------------------------------------
# Pure-JAX f32 reference for correctness check
# ---------------------------------------------------------------------------
def reference_forward(params, x, y, *, use_audio=False, x_gate=True):
    out_x = x @ params["wx"] + params["bx"]
    if use_audio:
        out_y = y @ params["wy"] + params["by"]
        if x_gate:
            h = jax.nn.sigmoid(out_x) * out_y
        else:
            h = out_x * jax.nn.sigmoid(out_y)
        return h @ params["wo"] + params["bo"]
    return out_x @ params["wo"] + params["bo"]


if __name__ == "__main__":
    B, INPUT_DIM, DIM, OUTPUT_DIM = 8, 32, 32, 16

    key = jax.random.PRNGKey(0)
    kp, kx, ky = jax.random.split(key, 3)
    params = init_params(kp, INPUT_DIM, DIM, OUTPUT_DIM)
    x = jax.random.normal(kx, (B, INPUT_DIM), jnp.float32)
    y = jax.random.normal(ky, (B, INPUT_DIM), jnp.float32)

    # One-time weight preparation (default fast bf16 path + f32 for tight check).
    prep_bf16 = prepare_params(params)                              # default bf16
    prep_f32 = prepare_params(params, compute_dtype=jnp.float32)    # exactness check

    ok = True
    for use_audio in (True, False):
        for x_gate in (True, False):
            ref = reference_forward(params, x, y,
                                    use_audio=use_audio, x_gate=x_gate)

            out32 = jax.block_until_ready(
                gated_fusion_forward(prep_f32, x, y,
                                     use_audio=use_audio, x_gate=x_gate))
            ok &= bool(jnp.allclose(out32, ref, atol=1e-4, rtol=1e-4))

            outbf = jax.block_until_ready(
                gated_fusion_forward(prep_bf16, x, y,
                                     use_audio=use_audio, x_gate=x_gate))
            ok &= bool(jnp.allclose(outbf, ref, atol=1e-1, rtol=1e-1))

    # Also exercise the weight-streaming (dim-tiled) kernel path.
    ref = reference_forward(params, x, y, use_audio=True, x_gate=True)
    out_dt = jax.block_until_ready(
        gated_fusion_forward(prep_bf16, x, y, use_audio=True, x_gate=True,
                             force_dim_tiling=True))
    ok &= bool(jnp.allclose(out_dt, ref, atol=1e-1, rtol=1e-1))

    print("KERNEL_OK" if ok else "MISMATCH")
</pallas_src>

<mosaic_0001>
module attributes {stable_mosaic.version = 11 : i64} {
  func.func @_audio_resident_kernel(%arg0: i32, %arg1: memref<8x128xf32, #tpu.memory_space<vmem>>, %arg2: memref<8x128xf32, #tpu.memory_space<vmem>>, %arg3: memref<128x128xf32, #tpu.memory_space<vmem>>, %arg4: memref<1x128xf32, #tpu.memory_space<vmem>>, %arg5: memref<128x128xf32, #tpu.memory_space<vmem>>, %arg6: memref<1x128xf32, #tpu.memory_space<vmem>>, %arg7: memref<128x128xf32, #tpu.memory_space<vmem>>, %arg8: memref<1x128xf32, #tpu.memory_space<vmem>>, %arg9: memref<8x128xf32, #tpu.memory_space<vmem>>) attributes {dimension_semantics = [#tpu.dimension_semantics<parallel>], iteration_bounds = array<i64: 1>, scalar_prefetch = 0 : i64, scratch_operands = 0 : i64, tpu.core_type = #tpu.core_type<tc>, window_params = [{transform_indices = @transform_0, window_bounds = array<i64: 8, 128>}, {transform_indices = @transform_1, window_bounds = array<i64: 8, 128>}, {pipeline_mode = #tpu.pipeline_mode<synchronous>, transform_indices = @transform_2, window_bounds = array<i64: 128, 128>}, {pipeline_mode = #tpu.pipeline_mode<synchronous>, transform_indices = @transform_3, window_bounds = array<i64: 1, 128>}, {pipeline_mode = #tpu.pipeline_mode<synchronous>, transform_indices = @transform_4, window_bounds = array<i64: 128, 128>}, {pipeline_mode = #tpu.pipeline_mode<synchronous>, transform_indices = @transform_5, window_bounds = array<i64: 1, 128>}, {pipeline_mode = #tpu.pipeline_mode<synchronous>, transform_indices = @transform_6, window_bounds = array<i64: 128, 128>}, {pipeline_mode = #tpu.pipeline_mode<synchronous>, transform_indices = @transform_7, window_bounds = array<i64: 1, 128>}, {transform_indices = @transform_8, window_bounds = array<i64: 8, 128>}]} {
    %c0 = arith.constant 0 : index
    %c0_0 = arith.constant 0 : index
    %0 = vector.load %arg1[%c0, %c0_0] : memref<8x128xf32, #tpu.memory_space<vmem>>, vector<8x128xf32>
    %c0_1 = arith.constant 0 : index
    %c0_2 = arith.constant 0 : index
    %1 = vector.load %arg3[%c0_1, %c0_2] : memref<128x128xf32, #tpu.memory_space<vmem>>, vector<128x128xf32>
    %cst = arith.constant dense<0.000000e+00> : vector<8x128xf32>
    %2 = tpu.matmul %0, %1, %cst {dimension_numbers = #tpu.dot_dimension_numbers<[1], [0], [0], [1], [0, 0, 1, 1], [], []>} : vector<8x128xf32>, vector<128x128xf32>, vector<8x128xf32> -> vector<8x128xf32>
    %c0_3 = arith.constant 0 : index
    %c0_4 = arith.constant 0 : index
    %3 = vector.load %arg2[%c0_3, %c0_4] : memref<8x128xf32, #tpu.memory_space<vmem>>, vector<8x128xf32>
    %c0_5 = arith.constant 0 : index
    %c0_6 = arith.constant 0 : index
    %4 = vector.load %arg5[%c0_5, %c0_6] : memref<128x128xf32, #tpu.memory_space<vmem>>, vector<128x128xf32>
    %cst_7 = arith.constant dense<0.000000e+00> : vector<8x128xf32>
    %5 = tpu.matmul %3, %4, %cst_7 {dimension_numbers = #tpu.dot_dimension_numbers<[1], [0], [0], [1], [0, 0, 1, 1], [], []>} : vector<8x128xf32>, vector<128x128xf32>, vector<8x128xf32> -> vector<8x128xf32>
    %c0_8 = arith.constant 0 : index
    %c0_9 = arith.constant 0 : index
    %6 = vector.load %arg4[%c0_8, %c0_9] : memref<1x128xf32, #tpu.memory_space<vmem>>, vector<1x128xf32>
    %7 = vector.broadcast %6 : vector<1x128xf32> to vector<8x128xf32>
    %8 = arith.addf %2, %7 : vector<8x128xf32>
    %c0_10 = arith.constant 0 : index
    %c0_11 = arith.constant 0 : index
    %9 = vector.load %arg6[%c0_10, %c0_11] : memref<1x128xf32, #tpu.memory_space<vmem>>, vector<1x128xf32>
    %10 = vector.broadcast %9 : vector<1x128xf32> to vector<8x128xf32>
    %11 = arith.addf %5, %10 : vector<8x128xf32>
    %12 = arith.negf %8 : vector<8x128xf32>
    %13 = math.exp %12 : vector<8x128xf32>
    %cst_12 = arith.constant 1.000000e+00 : f32
    %14 = vector.broadcast %cst_12 : f32 to vector<8x128xf32>
    %15 = arith.addf %14, %13 : vector<8x128xf32>
    %16 = arith.divf %14, %15 : vector<8x128xf32>
    %17 = arith.mulf %16, %11 : vector<8x128xf32>
    %c0_13 = arith.constant 0 : index
    %c0_14 = arith.constant 0 : index
    %18 = vector.load %arg7[%c0_13, %c0_14] : memref<128x128xf32, #tpu.memory_space<vmem>>, vector<128x128xf32>
    %cst_15 = arith.constant dense<0.000000e+00> : vector<8x128xf32>
    %19 = tpu.matmul %17, %18, %cst_15 {dimension_numbers = #tpu.dot_dimension_numbers<[1], [0], [0], [1], [0, 0, 1, 1], [], []>} : vector<8x128xf32>, vector<128x128xf32>, vector<8x128xf32> -> vector<8x128xf32>
    %c0_16 = arith.constant 0 : index
    %c0_17 = arith.constant 0 : index
    %20 = vector.load %arg8[%c0_16, %c0_17] : memref<1x128xf32, #tpu.memory_space<vmem>>, vector<1x128xf32>
    %21 = vector.broadcast %20 : vector<1x128xf32> to vector<8x128xf32>
    %22 = arith.addf %19, %21 : vector<8x128xf32>
    %c0_18 = arith.constant 0 : index
    %c0_19 = arith.constant 0 : index
    %23 = vector.load %arg9[%c0_18, %c0_19] : memref<8x128xf32, #tpu.memory_space<vmem>>, vector<8x128xf32>
    tpu.vector_store %arg9[%c0_18, %c0_19], %22 {strides = array<i32>} : memref<8x128xf32, #tpu.memory_space<vmem>>, vector<8x128xf32>,
    return
  }
  func.func @transform_0(%arg0: i32) -> (i32, i32) {
    %c0_i32 = arith.constant 0 : i32
    %c0_i32_0 = arith.constant 0 : i32
    return %arg0, %c0_i32 : i32, i32
  }
  func.func @transform_1(%arg0: i32) -> (i32, i32) {
    %c0_i32 = arith.constant 0 : i32
    %c0_i32_0 = arith.constant 0 : i32
    return %arg0, %c0_i32 : i32, i32
  }
  func.func @transform_2(%arg0: i32) -> (i32, i32) {
    %c0_i32 = arith.constant 0 : i32
    %c0_i32_0 = arith.constant 0 : i32
    %c0_i32_1 = arith.constant 0 : i32
    return %c0_i32, %c0_i32_0 : i32, i32
  }
  func.func @transform_3(%arg0: i32) -> (i32, i32) {
    %c0_i32 = arith.constant 0 : i32
    %c0_i32_0 = arith.constant 0 : i32
    %c0_i32_1 = arith.constant 0 : i32
    return %c0_i32, %c0_i32_0 : i32, i32
  }
  func.func @transform_4(%arg0: i32) -> (i32, i32) {
    %c0_i32 = arith.constant 0 : i32
    %c0_i32_0 = arith.constant 0 : i32
    %c0_i32_1 = arith.constant 0 : i32
    return %c0_i32, %c0_i32_0 : i32, i32
  }
  func.func @transform_5(%arg0: i32) -> (i32, i32) {
    %c0_i32 = arith.constant 0 : i32
    %c0_i32_0 = arith.constant 0 : i32
    %c0_i32_1 = arith.constant 0 : i32
    return %c0_i32, %c0_i32_0 : i32, i32
  }
  func.func @transform_6(%arg0: i32) -> (i32, i32) {
    %c0_i32 = arith.constant 0 : i32
    %c0_i32_0 = arith.constant 0 : i32
    %c0_i32_1 = arith.constant 0 : i32
    return %c0_i32, %c0_i32_0 : i32, i32
  }
  func.func @transform_7(%arg0: i32) -> (i32, i32) {
    %c0_i32 = arith.constant 0 : i32
    %c0_i32_0 = arith.constant 0 : i32
    %c0_i32_1 = arith.constant 0 : i32
    return %c0_i32, %c0_i32_0 : i32, i32
  }
  func.func @transform_8(%arg0: i32) -> (i32, i32) {
    %c0_i32 = arith.constant 0 : i32
    %c0_i32_0 = arith.constant 0 : i32
    return %arg0, %c0_i32 : i32, i32
  }
}

module attributes {stable_mosaic.version = 11 : i64} {
  func.func @_audio_resident_kernel(%arg0: i32, %arg1: memref<8x128xf32, #tpu.memory_space<vmem>>, %arg2: memref<8x128xf32, #tpu.memory_space<vmem>>, %arg3: memref<128x128xf32, #tpu.memory_space<vmem>>, %arg4: memref<1x128xf32, #tpu.memory_space<vmem>>, %arg5: memref<128x128xf32, #tpu.memory_space<vmem>>, %arg6: memref<1x128xf32, #tpu.memory_space<vmem>>, %arg7: memref<128x128xf32, #tpu.memory_space<vmem>>, %arg8: memref<1x128xf32, #tpu.memory_space<vmem>>, %arg9: memref<8x128xf32, #tpu.memory_space<vmem>>) attributes {dimension_semantics = [#tpu.dimension_semantics<parallel>], iteration_bounds = array<i64: 1>, scalar_prefetch = 0 : i64, scratch_operands = 0 : i64, tpu.core_type = #tpu.core_type<tc>, window_params = [{transform_indices = @transform_0, window_bounds = array<i64: 8, 128>}, {transform_indices = @transform_1, window_bounds = array<i64: 8, 128>}, {pipeline_mode = #tpu.pipeline_mode<synchronous>, transform_indices = @transform_2, window_bounds = array<i64: 128, 128>}, {pipeline_mode = #tpu.pipeline_mode<synchronous>, transform_indices = @transform_3, window_bounds = array<i64: 1, 128>}, {pipeline_mode = #tpu.pipeline_mode<synchronous>, transform_indices = @transform_4, window_bounds = array<i64: 128, 128>}, {pipeline_mode = #tpu.pipeline_mode<synchronous>, transform_indices = @transform_5, window_bounds = array<i64: 1, 128>}, {pipeline_mode = #tpu.pipeline_mode<synchronous>, transform_indices = @transform_6, window_bounds = array<i64: 128, 128>}, {pipeline_mode = #tpu.pipeline_mode<synchronous>, transform_indices = @transform_7, window_bounds = array<i64: 1, 128>}, {transform_indices = @transform_8, window_bounds = array<i64: 8, 128>}]} {
    %c0 = arith.constant 0 : index
    %c0_0 = arith.constant 0 : index
    %0 = vector.load %arg1[%c0, %c0_0] : memref<8x128xf32, #tpu.memory_space<vmem>>, vector<8x128xf32>
    %c0_1 = arith.constant 0 : index
    %c0_2 = arith.constant 0 : index
    %1 = vector.load %arg3[%c0_1, %c0_2] : memref<128x128xf32, #tpu.memory_space<vmem>>, vector<128x128xf32>
    %cst = arith.constant dense<0.000000e+00> : vector<8x128xf32>
    %2 = tpu.matmul %0, %1, %cst {dimension_numbers = #tpu.dot_dimension_numbers<[1], [0], [0], [1], [0, 0, 1, 1], [], []>} : vector<8x128xf32>, vector<128x128xf32>, vector<8x128xf32> -> vector<8x128xf32>
    %c0_3 = arith.constant 0 : index
    %c0_4 = arith.constant 0 : index
    %3 = vector.load %arg2[%c0_3, %c0_4] : memref<8x128xf32, #tpu.memory_space<vmem>>, vector<8x128xf32>
    %c0_5 = arith.constant 0 : index
    %c0_6 = arith.constant 0 : index
    %4 = vector.load %arg5[%c0_5, %c0_6] : memref<128x128xf32, #tpu.memory_space<vmem>>, vector<128x128xf32>
    %cst_7 = arith.constant dense<0.000000e+00> : vector<8x128xf32>
    %5 = tpu.matmul %3, %4, %cst_7 {dimension_numbers = #tpu.dot_dimension_numbers<[1], [0], [0], [1], [0, 0, 1, 1], [], []>} : vector<8x128xf32>, vector<128x128xf32>, vector<8x128xf32> -> vector<8x128xf32>
    %c0_8 = arith.constant 0 : index
    %c0_9 = arith.constant 0 : index
    %6 = vector.load %arg4[%c0_8, %c0_9] : memref<1x128xf32, #tpu.memory_space<vmem>>, vector<1x128xf32>
    %7 = vector.broadcast %6 : vector<1x128xf32> to vector<8x128xf32>
    %8 = arith.addf %2, %7 : vector<8x128xf32>
    %c0_10 = arith.constant 0 : index
    %c0_11 = arith.constant 0 : index
    %9 = vector.load %arg6[%c0_10, %c0_11] : memref<1x128xf32, #tpu.memory_space<vmem>>, vector<1x128xf32>
    %10 = vector.broadcast %9 : vector<1x128xf32> to vector<8x128xf32>
    %11 = arith.addf %5, %10 : vector<8x128xf32>
    %12 = arith.negf %8 : vector<8x128xf32>
    %13 = math.exp %12 : vector<8x128xf32>
    %cst_12 = arith.constant 1.000000e+00 : f32
    %14 = vector.broadcast %cst_12 : f32 to vector<8x128xf32>
    %15 = arith.addf %14, %13 : vector<8x128xf32>
    %16 = arith.divf %14, %15 : vector<8x128xf32>
    %17 = arith.mulf %16, %11 : vector<8x128xf32>
    %c0_13 = arith.constant 0 : index
    %c0_14 = arith.constant 0 : index
    %18 = vector.load %arg7[%c0_13, %c0_14] : memref<128x128xf32, #tpu.memory_space<vmem>>, vector<128x128xf32>
    %cst_15 = arith.constant dense<0.000000e+00> : vector<8x128xf32>
    %19 = tpu.matmul %17, %18, %cst_15 {dimension_numbers = #tpu.dot_dimension_numbers<[1], [0], [0], [1], [0, 0, 1, 1], [], []>} : vector<8x128xf32>, vector<128x128xf32>, vector<8x128xf32> -> vector<8x128xf32>
    %c0_16 = arith.constant 0 : index
    %c0_17 = arith.constant 0 : index
    %20 = vector.load %arg8[%c0_16, %c0_17] : memref<1x128xf32, #tpu.memory_space<vmem>>, vector<1x128xf32>
    %21 = vector.broadcast %20 : vector<1x128xf32> to vector<8x128xf32>
    %22 = arith.addf %19, %21 : vector<8x128xf32>
    %c0_18 = arith.constant 0 : index
    %c0_19 = arith.constant 0 : index
    %23 = vector.load %arg9[%c0_18, %c0_19] : memref<8x128xf32, #tpu.memory_space<vmem>>, vector<8x128xf32>
    tpu.vector_store %arg9[%c0_18, %c0_19], %22 {strides = array<i32>} : memref<8x128xf32, #tpu.memory_space<vmem>>, vector<8x128xf32>,
    return
  }
  func.func @transform_0(%arg0: i32) -> (i32, i32) {
    %c0_i32 = arith.constant 0 : i32
    %c0_i32_0 = arith.constant 0 : i32
    return %arg0, %c0_i32 : i32, i32
  }
  func.func @transform_1(%arg0: i32) -> (i32, i32) {
    %c0_i32 = arith.constant 0 : i32
    %c0_i32_0 = arith.constant 0 : i32
    return %arg0, %c0_i32 : i32, i32
  }
  func.func @transform_2(%arg0: i32) -> (i32, i32) {
    %c0_i32 = arith.constant 0 : i32
    %c0_i32_0 = arith.constant 0 : i32
    %c0_i32_1 = arith.constant 0 : i32
    return %c0_i32, %c0_i32_0 : i32, i32
  }
  func.func @transform_3(%arg0: i32) -> (i32, i32) {
    %c0_i32 = arith.constant 0 : i32
    %c0_i32_0 = arith.constant 0 : i32
    %c0_i32_1 = arith.constant 0 : i32
    return %c0_i32, %c0_i32_0 : i32, i32
  }
  func.func @transform_4(%arg0: i32) -> (i32, i32) {
    %c0_i32 = arith.constant 0 : i32
    %c0_i32_0 = arith.constant 0 : i32
    %c0_i32_1 = arith.constant 0 : i32
    return %c0_i32, %c0_i32_0 : i32, i32
  }
  func.func @transform_5(%arg0: i32) -> (i32, i32) {
    %c0_i32 = arith.constant 0 : i32
    %c0_i32_0 = arith.constant 0 : i32
    %c0_i32_1 = arith.constant 0 : i32
    return %c0_i32, %c0_i32_0 : i32, i32
  }
  func.func @transform_6(%arg0: i32) -> (i32, i32) {
    %c0_i32 = arith.constant 0 : i32
    %c0_i32_0 = arith.constant 0 : i32
    %c0_i32_1 = arith.constant 0 : i32
    return %c0_i32, %c0_i32_0 : i32, i32
  }
  func.func @transform_7(%arg0: i32) -> (i32, i32) {
    %c0_i32 = arith.constant 0 : i32
    %c0_i32_0 = arith.constant 0 : i32
    %c0_i32_1 = arith.constant 0 : i32
    return %c0_i32, %c0_i32_0 : i32, i32
  }
  func.func @transform_8(%arg0: i32) -> (i32, i32) {
    %c0_i32 = arith.constant 0 : i32
    %c0_i32_0 = arith.constant 0 : i32
    return %arg0, %c0_i32 : i32, i32
  }
}

</mosaic_0001>

<bundles_post_ra>
// kernel: tpu_custom_call.1
= control target key start
LH: loop header
LB: loop body
LE: loop exit
PB: predicated region body
PF: predicated region fallthrough
CT: control target
= control target key end

     0   :  { %13 = vsyncpa [#allocation3], 0  ;;  %s963_s0 = inlined_call_operand.hbm [shape: f32[8,128], index: 0, kind: input, shape index: {}]   ;;  %s964_s1 = inlined_call_operand.hbm [shape: f32[8,128], index: 1, kind: input, shape index: {}]   ;;  %s965_s2 = inlined_call_operand.hbm [shape: f32[128,128], index: 2, kind: input, shape index: {}]   ;;  %s966_s3 = inlined_call_operand.vmem [shape: f32[1,128], index: 3, kind: input, shape index: {}]   ;;  %s967_s4 = inlined_call_operand.hbm [shape: f32[128,128], index: 4, kind: input, shape index: {}]   ;;  %s968_s5 = inlined_call_operand.vmem [shape: f32[1,128], index: 5, kind: input, shape index: {}]   ;;  %s969_s6 = inlined_call_operand.hbm [shape: f32[128,128], index: 6, kind: input, shape index: {}]   ;;  %s970_s7 = inlined_call_operand.vmem [shape: f32[1,128], index: 7, kind: input, shape index: {}]   ;;  %s971_s8 = inlined_call_operand.hbm [shape: f32[8,128], index: 8, kind: output, shape index: {}]  }
   0x1   :  { %14 = vsyncpa [#allocation6], 0 }
   0x2   :  { %15 = vsyncpa [#allocation9], 0 }
   0x3   :  { %16 = vsyncpa [#allocation4], 0  ;;  %s787_s27 = smov [#allocation5]   ;;  %s647_s9 = scalar_lea.hbm %s964_s1, 128 }
   0x4   :  { %s33_s28 = sshll.u32 %s787_s27, 4  ;;  %p648_p0 = scmp.ne.s32.totalorder %s964_s1, %s647_s9  ;;  %s34_s28 = int_to_ptr.vmem [resolvable:$true] %s33_s28 }
   0x5   :  { %p651_p1 = scmp.lt.u32.totalorder %s647_s9, %s964_s1 }
   0x7   :  { %p653_p2 = pnand %p651_p1, %p648_p0 }
   0x9   :  { %656 = shalt.err (!%p653_p2)
}
   0xa   :  { %s657_s14 = scalar_lea.vmem %s34_s28, 128  ;;  %p662_p4 = scmp.lt.s32.totalorder %s34_s28, %s34_s28 }
   0xb   :  { %p658_p3 = scmp.ne.s32.totalorder %s34_s28, %s657_s14  ;;  %p663_p5 = scmp.lt.s32.totalorder %s657_s14, %s657_s14 }
   0xd   :  { %p664_p6 = por %p663_p5, %p662_p4 }
   0xf   :  { %p665_p7 = pnand %p664_p6, %p658_p3 }
  0x11   :  { %668 = shalt.err (!%p665_p7)
}
  0x12   :  { %36 = dma.hbm_to_vmem [thread:$0]  %s964_s1, 128, %s34_s28, [#allocation6]  }
  0x13   :  { %s788_s17 = smov [#allocation8]   ;;  %s789_s19 = smov [#allocation2]  }
  0x14   :  { %s56_s18 = sshll.u32 %s788_s17, 4  ;;  %s23_s20 = sshll.u32 %s789_s19, 4  ;;  %s57_s18 = int_to_ptr.vmem [resolvable:$true] %s56_s18  ;;  %s24_s20 = int_to_ptr.vmem [resolvable:$true] %s23_s20 }
  0x15   :  { %s669_s23 = scalar_lea.hbm %s967_s4, 2048 }
  0x16   :  { %p670_p8 = scmp.ne.s32.totalorder %s967_s4, %s669_s23  ;;  %p673_p9 = scmp.lt.u32.totalorder %s669_s23, %s967_s4 }
  0x18   :  { %p675_p10 = pnand %p673_p9, %p670_p8 }
  0x1a   :  { %678 = shalt.err (!%p675_p10)
}
  0x1b   :  { %s679_s1 = scalar_lea.vmem %s57_s18, 2048  ;;  %p684_p12 = scmp.lt.s32.totalorder %s57_s18, %s57_s18 }
  0x1c   :  { %p680_p11 = scmp.ne.s32.totalorder %s57_s18, %s679_s1  ;;  %p685_p13 = scmp.lt.s32.totalorder %s679_s1, %s679_s1 }
  0x1e   :  { %p686_p0 = por %p685_p13, %p684_p12 }
  0x20   :  { %p687_p1 = pnand %p686_p0, %p680_p11 }
  0x22   :  { %690 = shalt.err (!%p687_p1)
}
  0x23   :  { %s790_s28 = smov 128   ;;  %s791_s29 = smov 8  }
  0x24   :  { %62 = dma.hbm_to_vmem [thread:$0]  %s967_s4, 2048, %s57_s18, [#allocation9], %s790_s28, %s790_s28, %s791_s29  }
  0x25   :  { %s691_s12 = scalar_lea.hbm %s963_s0, 128 }
  0x26   :  { %p692_p2 = scmp.ne.s32.totalorder %s963_s0, %s691_s12  ;;  %p695_p3 = scmp.lt.u32.totalorder %s691_s12, %s963_s0 }
  0x28   :  { %p697_p4 = pnand %p695_p3, %p692_p2 }
  0x2a   :  { %700 = shalt.err (!%p697_p4)
}
  0x2b   :  { %s701_s17 = scalar_lea.vmem %s24_s20, 128  ;;  %p706_p6 = scmp.lt.s32.totalorder %s24_s20, %s24_s20 }
  0x2c   :  { %p702_p5 = scmp.ne.s32.totalorder %s24_s20, %s701_s17  ;;  %p707_p7 = scmp.lt.s32.totalorder %s701_s17, %s701_s17 }
  0x2e   :  { %p708_p8 = por %p707_p7, %p706_p6 }
  0x30   :  { %p709_p9 = pnand %p708_p8, %p702_p5 }
  0x32   :  { %712 = shalt.err (!%p709_p9)
}
  0x33   :  { %26 = dma.hbm_to_vmem [thread:$0]  %s963_s0, 128, %s24_s20, [#allocation3]  }
  0x34   :  { %s792_s19 = smov [#allocation7]   ;;  %s793_s22 = smov [#allocation10]  }
  0x35   :  { %s42_s21 = sshll.u32 %s792_s19, 4  ;;  %s70_s23 = sshll.u32 %s793_s22, 4  ;;  %s43_s21 = int_to_ptr.vmem [resolvable:$true] %s42_s21  ;;  %s71_s23 = int_to_ptr.vmem [resolvable:$true] %s70_s23 }
  0x36   :  { %s713_s26 = scalar_lea.hbm %s965_s2, 2048 }
  0x37   :  { %p714_p10 = scmp.ne.s32.totalorder %s965_s2, %s713_s26  ;;  %p717_p11 = scmp.lt.u32.totalorder %s713_s26, %s965_s2 }
  0x39   :  { %p719_p12 = pnand %p717_p11, %p714_p10 }
  0x3b   :  { %722 = shalt.err (!%p719_p12)
}
  0x3c   :  { %s723_s0 = scalar_lea.vmem %s43_s21, 2048  ;;  %p728_p0 = scmp.lt.s32.totalorder %s43_s21, %s43_s21 }
  0x3d   :  { %p724_p13 = scmp.ne.s32.totalorder %s43_s21, %s723_s0  ;;  %p729_p1 = scmp.lt.s32.totalorder %s723_s0, %s723_s0 }
  0x3f   :  { %p730_p2 = por %p729_p1, %p728_p0 }
  0x41   :  { %p731_p3 = pnand %p730_p2, %p724_p13 }
  0x43   :  { %734 = shalt.err (!%p731_p3)
}
  0x44   :  { %48 = dma.hbm_to_vmem [thread:$0]  %s965_s2, 2048, %s43_s21, [#allocation6], %s790_s28, %s790_s28, %s791_s29  }
  0x45   :  { %s735_s13 = scalar_lea.hbm %s969_s6, 2048 }
  0x46   :  { %p736_p4 = scmp.ne.s32.totalorder %s969_s6, %s735_s13  ;;  %p739_p5 = scmp.lt.u32.totalorder %s735_s13, %s969_s6 }
  0x48   :  { %p741_p6 = pnand %p739_p5, %p736_p4 }
  0x4a   :  { %744 = shalt.err (!%p741_p6)
}
  0x4b   :  { %s745_s4 = scalar_lea.vmem %s71_s23, 2048  ;;  %p750_p8 = scmp.lt.s32.totalorder %s71_s23, %s71_s23 }
  0x4c   :  { %p746_p7 = scmp.ne.s32.totalorder %s71_s23, %s745_s4  ;;  %p751_p9 = scmp.lt.s32.totalorder %s745_s4, %s745_s4 }
  0x4e   :  { %p752_p10 = por %p751_p9, %p750_p8 }
  0x50   :  { %p753_p11 = pnand %p752_p10, %p746_p7 }
  0x52   :  { %756 = shalt.err (!%p753_p11)
}
  0x53   :  { %76 = dma.hbm_to_vmem [thread:$0]  %s969_s6, 2048, %s71_s23, [#allocation9], %s790_s28, %s790_s28, %s791_s29  }
  0x54   :  { %779 = dma.done.wait [#allocation3], 128  }
  0x55   :  { %780 = vsyncadd [#allocation3], 4294967168 }
  0x56   :  { %781 = dma.done.wait [#allocation6], 2176  }
  0x57   :  { %782 = vsyncadd [#allocation6], 4294965120 }
  0x58   :  { %783 = dma.done.wait [#allocation9], 4096  }
  0x59   :  { %784 = vsyncadd [#allocation9], 4294963200  ;;  %v794_v0 = vmov 0.0|0.0   ;;  %vm795_vm0 = vmmov 0   ;;  %v796_v1 = vmov 0.0   ;;  %v95_v2 = vld [vmem:[#allocation7] sm:$0xff] }
  0x5a   :  { %560 = vmatprep.subr.bf16.mxu0 %v794_v0  ;;  %584 = vmatprep.subr.bf16.mxu1 %v794_v0  ;;  %v96_v3 = vld [vmem:[#allocation7 + $0x8] sm:$0xff]  ;;  %v97_v4 = vld [vmem:[#allocation7 + $0x10] sm:$0xff]  ;;  %v98_v6 = vld [vmem:[#allocation7 + $0x18] sm:$0xff]  ;;  %s797_s22 = smov [#allocation11]  }
  0x5b   :  { %487 = vmatprep.mubr.msk.f32.mxu0 %vm795_vm0, %v796_v1  ;;  %522 = vmatprep.mubr.msk.f32.mxu1 %vm795_vm0, %v796_v1  ;;  %v561_v5 = vpack.c.bf16 %v96_v3, %v95_v2  ;;  %v564_v7 = vpack.c.bf16 %v98_v6, %v97_v4  ;;  %v99_v8 = vld [vmem:[#allocation7 + $0x20] sm:$0xff]  ;;  %v100_v9 = vld [vmem:[#allocation7 + $0x28] sm:$0xff]  ;;  %v114_v13 = vld [vmem:[#allocation8 + $0x10] sm:$0xff]  ;;  %s389_s23 = sshll.u32 %s797_s22, 4  ;;  %s390_s23 = int_to_ptr.vmem [resolvable:$true] %s389_s23 }
  0x5c   :  { %v112_v10 = vld [vmem:[#allocation8] sm:$0xff]  ;;  %v113_v11 = vld [vmem:[#allocation8 + $0x8] sm:$0xff]  ;;  %v115_v14 = vld [vmem:[#allocation8 + $0x18] sm:$0xff]  ;;  %v567_v15 = vpack.c.bf16 %v100_v9, %v99_v8  ;;  %s757_s24 = scalar_lea.vmem %s390_s23, 128  ;;  %p762_p13 = scmp.lt.s32.totalorder %s390_s23, %s390_s23 }
  0x5d   :  { %562 = vmatpush3.bf16.msra.mxu0 %v561_v5  ;;  %v585_v12 = vpack.c.bf16 %v113_v11, %v112_v10  ;;  %v101_v16 = vld [vmem:[#allocation7 + $0x30] sm:$0xff]  ;;  %v102_v17 = vld [vmem:[#allocation7 + $0x38] sm:$0xff]  ;;  %v588_v18 = vpack.c.bf16 %v115_v14, %v114_v13  ;;  %v116_v19 = vld [vmem:[#allocation8 + $0x20] sm:$0xff]  ;;  %p758_p12 = scmp.ne.s32.totalorder %s390_s23, %s757_s24  ;;  %p763_p0 = scmp.lt.s32.totalorder %s757_s24, %s757_s24 }
  0x5e   :  { %563 = vmatprep.subr.bf16.mxu0 %v794_v0  ;;  %v117_v20 = vld [vmem:[#allocation8 + $0x28] sm:$0xff]  ;;  %v570_v21 = vpack.c.bf16 %v102_v17, %v101_v16  ;;  %v103_v22 = vld [vmem:[#allocation7 + $0x40] sm:$0xff]  ;;  %v118_v25 = vld [vmem:[#allocation8 + $0x30] sm:$0xff] }
  0x5f   :  { %586 = vmatpush3.bf16.msra.mxu1 %v585_v12  ;;  %v104_v23 = vld [vmem:[#allocation7 + $0x48] sm:$0xff]  ;;  %v591_v24 = vpack.c.bf16 %v117_v20, %v116_v19  ;;  %v119_v26 = vld [vmem:[#allocation8 + $0x38] sm:$0xff]  ;;  %v105_v28 = vld [vmem:[#allocation7 + $0x50] sm:$0xff]  ;;  %p764_p1 = por %p763_p0, %p762_p13 }
  0x60   :  { %587 = vmatprep.subr.bf16.mxu1 %v794_v0  ;;  %v573_v27 = vpack.c.bf16 %v104_v23, %v103_v22  ;;  %v106_v29 = vld [vmem:[#allocation7 + $0x58] sm:$0xff]  ;;  %v594_v30 = vpack.c.bf16 %v119_v26, %v118_v25  ;;  %v120_v31 = vld [vmem:[#allocation8 + $0x40] sm:$0xff]  ;;  %v121_v32 = vld [vmem:[#allocation8 + $0x48] sm:$0xff] }
  0x61   :  { %565 = vmatpush3.bf16.msra.mxu0 %v564_v7  ;;  %v576_v33 = vpack.c.bf16 %v106_v29, %v105_v28  ;;  %v107_v34 = vld [vmem:[#allocation7 + $0x60] sm:$0xff]  ;;  %v108_v35 = vld [vmem:[#allocation7 + $0x68] sm:$0xff]  ;;  %v597_v36 = vpack.c.bf16 %v121_v32, %v120_v31  ;;  %v122_v37 = vld [vmem:[#allocation8 + $0x50] sm:$0xff]  ;;  %p765_p2 = pnand %p764_p1, %p758_p12 }
  0x62   :  { %566 = vmatprep.subr.bf16.mxu0 %v794_v0  ;;  %v123_v38 = vld [vmem:[#allocation8 + $0x58] sm:$0xff]  ;;  %v579_v39 = vpack.c.bf16 %v108_v35, %v107_v34  ;;  %v109_v40 = vld [vmem:[#allocation7 + $0x70] sm:$0xff]  ;;  %v124_v43 = vld [vmem:[#allocation8 + $0x60] sm:$0xff] }
  0x63   :  { %589 = vmatpush3.bf16.msra.mxu1 %v588_v18  ;;  %v110_v41 = vld [vmem:[#allocation7 + $0x78] sm:$0xff]  ;;  %v600_v42 = vpack.c.bf16 %v123_v38, %v122_v37  ;;  %v125_v44 = vld [vmem:[#allocation8 + $0x68] sm:$0xff]  ;;  %v126_v47 = vld [vmem:[#allocation8 + $0x70] sm:$0xff] }
  0x64   :  { %590 = vmatprep.subr.bf16.mxu1 %v794_v0  ;;  %v582_v45 = vpack.c.bf16 %v110_v41, %v109_v40  ;;  %v603_v46 = vpack.c.bf16 %v125_v44, %v124_v43  ;;  %v127_v48 = vld [vmem:[#allocation8 + $0x78] sm:$0xff]  ;;  %v94_v49 = vld [vmem:[#allocation2] sm:$0xff]  ;;  %v289_v52 = vld [vmem:[#allocation10] sm:$0xff] }
  0x65   :  { %568 = vmatpush3.bf16.msra.mxu0 %v567_v15  ;;  %v606_v50 = vpack.c.bf16 %v127_v48, %v126_v47  ;;  %v111_v51 = vld [vmem:[#allocation5] sm:$0xff]  ;;  %v290_v53 = vld [vmem:[#allocation10 + $0x8] sm:$0xff]  ;;  %v291_v55 = vld [vmem:[#allocation10 + $0x10] sm:$0xff] }
  0x66   :  { %569 = vmatprep.subr.bf16.mxu0 %v794_v0  ;;  %v609_v54 = vpack.c.bf16 %v290_v53, %v289_v52  ;;  %v292_v56 = vld [vmem:[#allocation10 + $0x18] sm:$0xff]  ;;  %v293_v58 = vld [vmem:[#allocation10 + $0x20] sm:$0xff]  ;;  %v294_v59 = vld [vmem:[#allocation10 + $0x28] sm:$0xff] }
  0x67   :  { %592 = vmatpush3.bf16.msra.mxu1 %v591_v24  ;;  %v612_v57 = vpack.c.bf16 %v292_v56, %v291_v55  ;;  %v615_v60 = vpack.c.bf16 %v294_v59, %v293_v58  ;;  %v295_v61 = vld [vmem:[#allocation10 + $0x30] sm:$0xff]  ;;  %v296_v62 = vld [vmem:[#allocation10 + $0x38] sm:$0xff]  ;;  %v298_v2 = vld [vmem:[#allocation10 + $0x48] sm:$0xff] }
  0x68   :  { %593 = vmatprep.subr.bf16.mxu1 %v794_v0  ;;  %v618_v63 = vpack.c.bf16 %v296_v62, %v295_v61  ;;  %v299_v4 = vld [vmem:[#allocation10 + $0x50] sm:$0xff]  ;;  %v300_v5 = vld [vmem:[#allocation10 + $0x58] sm:$0xff]  ;;  %v301_v7 = vld [vmem:[#allocation10 + $0x60] sm:$0xff] }
  0x69   :  { %571 = vmatpush3.bf16.msra.mxu0 %v570_v21  ;;  %v624_v6 = vpack.c.bf16 %v300_v5, %v299_v4  ;;  %v302_v8 = vld [vmem:[#allocation10 + $0x68] sm:$0xff]  ;;  %v303_v10 = vld [vmem:[#allocation10 + $0x70] sm:$0xff]  ;;  %v304_v11 = vld [vmem:[#allocation10 + $0x78] sm:$0xff] }
  0x6a   :  { %572 = vmatprep.subr.bf16.mxu0 %v794_v0  ;;  %v627_v9 = vpack.c.bf16 %v302_v8, %v301_v7  ;;  %v630_v12 = vpack.c.bf16 %v304_v11, %v303_v10  ;;  %v400_v13 = vld [vmem:[%s966_s3] ss:$0 sm:$0xff] }
  0x6b   :  { %595 = vmatpush3.bf16.msra.mxu1 %v594_v30  ;;  %v403_v25 = vld [vmem:[%s970_s7] ss:$0 sm:$0xff] }
  0x6c   :  { %596 = vmatprep.subr.bf16.mxu1 %v794_v0 }
  0x6d   :  { %574 = vmatpush3.bf16.msra.mxu0 %v573_v27 }
  0x6e   :  { %575 = vmatprep.subr.bf16.mxu0 %v794_v0 }
  0x6f   :  { %598 = vmatpush3.bf16.msra.mxu1 %v597_v36 }
  0x70   :  { %599 = vmatprep.subr.bf16.mxu1 %v794_v0 }
  0x71   :  { %577 = vmatpush3.bf16.msra.mxu0 %v576_v33 }
  0x72   :  { %578 = vmatprep.subr.bf16.mxu0 %v794_v0 }
  0x73   :  { %601 = vmatpush3.bf16.msra.mxu1 %v600_v42 }
  0x74   :  { %602 = vmatprep.subr.bf16.mxu1 %v794_v0 }
  0x75   :  { %580 = vmatpush3.bf16.msra.mxu0 %v579_v39 }
  0x76   :  { %581 = vmatprep.subr.bf16.mxu0 %v794_v0 }
  0x77   :  { %604 = vmatpush3.bf16.msra.mxu1 %v603_v46 }
  0x78   :  { %605 = vmatprep.subr.bf16.mxu1 %v794_v0 }
  0x79   :  { %583 = vmatpush3.bf16.msra.mxu0 %v582_v45 }
  0x7a   :  { %608 = vmatprep.subr.bf16.mxu0 %v794_v0 }
  0x7b   :  { %607 = vmatpush3.bf16.msra.mxu1 %v606_v50 }
  0x7c   :  { %488 = vmatmul.mubr.f32.vlgmr.msra.gmra.mrb[0].mxu0 %v94_v49 }
  0x7d   :  { %557 = vmatprep.mubr.msk.f32.mxu0 %vm795_vm0, %v796_v1  ;;  %610 = vmatpush3.bf16.msra.mxu0 %v609_v54  ;;  %v297_v1 = vld [vmem:[#allocation10 + $0x40] sm:$0xff] }
  0x7e   :  { %523 = vmatmul.mubr.f32.vlgmr.msra.gmra.mrb[0].mxu1 %v111_v51  ;;  %611 = vmatprep.subr.bf16.mxu0 %v794_v0  ;;  %v621_v3 = vpack.c.bf16 %v298_v2, %v297_v1 }
  0x81   :  { %613 = vmatpush3.bf16.msra.mxu0 %v612_v57 }
  0x82   :  { %614 = vmatprep.subr.bf16.mxu0 %v794_v0 }
  0x85   :  { %616 = vmatpush3.bf16.msra.mxu0 %v615_v60 }
  0x86   :  { %617 = vmatprep.subr.bf16.mxu0 %v794_v0 }
  0x89   :  { %619 = vmatpush3.bf16.msra.mxu0 %v618_v63 }
  0x8a   :  { %620 = vmatprep.subr.bf16.mxu0 %v794_v0 }
  0x8d   :  { %622 = vmatpush3.bf16.msra.mxu0 %v621_v3 }
  0x8e   :  { %623 = vmatprep.subr.bf16.mxu0 %v794_v0 }
  0x91   :  { %625 = vmatpush3.bf16.msra.mxu0 %v624_v6 }
  0x92   :  { %626 = vmatprep.subr.bf16.mxu0 %v794_v0 }
  0x95   :  { %628 = vmatpush3.bf16.msra.mxu0 %v627_v9 }
  0x96   :  { %629 = vmatprep.subr.bf16.mxu0 %v794_v0  ;;  %v401_v0 = vld [vmem:[%s968_s5] ss:$0 sm:$0xff] }
  0x99   :  { %631 = vmatpush3.bf16.msra.mxu0 %v630_v12 }
 0x14f   :  { %v201_v14 = vpop.f32.mrb[0].mxu0 }
 0x150   :  { %v202_v15 = vadd.f32 %v400_v13, %v201_v14  ;;  %v489_v16 = vpop.f32.mrb[1].mxu0 }
 0x151   :  { %v278_v18 = vpop.f32.mrb[0].mxu1 }
 0x152   :  { %v402_v17 = vmul.f32 -1.442695, %v202_v15  ;;  %v524_v19 = vpop.f32.mrb[1].mxu1  ;;  %v279_v22 = vadd.f32 %v401_v0, %v278_v18 }
 0x154   :  { %643 = vpow2.f32 %v402_v17 }
 0x15e   :  { %v644_v20 = vpop.eup %643 }
 0x15f   :  { %v285_v21 = vadd.f32 1.0, %v644_v20 }
 0x161   :  { %645 = vrcp.f32 %v285_v21 }
 0x16b   :  { %v646_v23 = vpop.eup %645 }
 0x16c   :  { %v288_v24 = vmul.f32 %v646_v23, %v279_v22 }
 0x16e   :  { %558 = vmatmul.mubr.f32.vlgmr.msra.gmra.mrb[2].mxu0 %v288_v24 }
 0x241   :  { %v378_v26 = vpop.f32.mrb[2].mxu0 }
 0x242   :  { %v379_v27 = vadd.f32 %v403_v25, %v378_v26  ;;  %v559_v28 = vpop.f32.mrb[3].mxu0 }
 0x244   :  { %382 = vst [vmem:[#allocation11] sm:$0xff] %v379_v27 }
 0x245   :  { %768 = shalt.err (!%p765_p2)
}
 0x246   :  { %s769_s26 = scalar_lea.hbm %s971_s8, 128 }
 0x247   :  { %p770_p3 = scmp.ne.s32.totalorder %s971_s8, %s769_s26  ;;  %p773_p4 = scmp.lt.u32.totalorder %s769_s26, %s971_s8 }
 0x249   :  { %p775_p5 = pnand %p773_p4, %p770_p3 }
 0x24b   :  { %778 = shalt.err (!%p775_p5)
}
 0x24c   :  { %392 = dma.vmem_to_hbm [thread:$0]  %s390_s23, 128, %s971_s8, [#allocation4]  }
 0x24d   :  { %785 = dma.done.wait [#allocation4], 128  }
 0x24e   :  { %786 = vsyncadd [#allocation4], 4294967168 }
 0x24f   :  { %396 = vsyncpa [#allocation3], 1 }
 0x250   :  { %397 = vsyncpa [#allocation6], 1 }
 0x251   :  { %398 = vsyncpa [#allocation9], 1 }
 0x252   :  { %399 = vsyncpa [#allocation4], 1 }

// kernel: tpu_custom_call.1
= control target key start
LH: loop header
LB: loop body
LE: loop exit
PB: predicated region body
PF: predicated region fallthrough
CT: control target
= control target key end

     0   :  { %13 = vsyncpa [#allocation3], 0  ;;  %s963_s0 = inlined_call_operand.hbm [shape: f32[8,128], index: 0, kind: input, shape index: {}]   ;;  %s964_s1 = inlined_call_operand.hbm [shape: f32[8,128], index: 1, kind: input, shape index: {}]   ;;  %s965_s2 = inlined_call_operand.hbm [shape: f32[128,128], index: 2, kind: input, shape index: {}]   ;;  %s966_s3 = inlined_call_operand.vmem [shape: f32[1,128], index: 3, kind: input, shape index: {}]   ;;  %s967_s4 = inlined_call_operand.hbm [shape: f32[128,128], index: 4, kind: input, shape index: {}]   ;;  %s968_s5 = inlined_call_operand.vmem [shape: f32[1,128], index: 5, kind: input, shape index: {}]   ;;  %s969_s6 = inlined_call_operand.hbm [shape: f32[128,128], index: 6, kind: input, shape index: {}]   ;;  %s970_s7 = inlined_call_operand.vmem [shape: f32[1,128], index: 7, kind: input, shape index: {}]   ;;  %s971_s8 = inlined_call_operand.hbm [shape: f32[8,128], index: 8, kind: output, shape index: {}]  }
   0x1   :  { %14 = vsyncpa [#allocation6], 0 }
   0x2   :  { %15 = vsyncpa [#allocation9], 0 }
   0x3   :  { %16 = vsyncpa [#allocation4], 0  ;;  %s787_s27 = smov [#allocation5]   ;;  %s647_s9 = scalar_lea.hbm %s964_s1, 128 }
   0x4   :  { %s33_s28 = sshll.u32 %s787_s27, 4  ;;  %p648_p0 = scmp.ne.s32.totalorder %s964_s1, %s647_s9  ;;  %s34_s28 = int_to_ptr.vmem [resolvable:$true] %s33_s28 }
   0x5   :  { %p651_p1 = scmp.lt.u32.totalorder %s647_s9, %s964_s1 }
   0x7   :  { %p653_p2 = pnand %p651_p1, %p648_p0 }
   0x9   :  { %656 = shalt.err (!%p653_p2)
}
   0xa   :  { %s657_s14 = scalar_lea.vmem %s34_s28, 128  ;;  %p662_p4 = scmp.lt.s32.totalorder %s34_s28, %s34_s28 }
   0xb   :  { %p658_p3 = scmp.ne.s32.totalorder %s34_s28, %s657_s14  ;;  %p663_p5 = scmp.lt.s32.totalorder %s657_s14, %s657_s14 }
   0xd   :  { %p664_p6 = por %p663_p5, %p662_p4 }
   0xf   :  { %p665_p7 = pnand %p664_p6, %p658_p3 }
  0x11   :  { %668 = shalt.err (!%p665_p7)
}
  0x12   :  { %36 = dma.hbm_to_vmem [thread:$0]  %s964_s1, 128, %s34_s28, [#allocation6]  }
  0x13   :  { %s788_s17 = smov [#allocation8]   ;;  %s789_s19 = smov [#allocation2]  }
  0x14   :  { %s56_s18 = sshll.u32 %s788_s17, 4  ;;  %s23_s20 = sshll.u32 %s789_s19, 4  ;;  %s57_s18 = int_to_ptr.vmem [resolvable:$true] %s56_s18  ;;  %s24_s20 = int_to_ptr.vmem [resolvable:$true] %s23_s20 }
  0x15   :  { %s669_s23 = scalar_lea.hbm %s967_s4, 2048 }
  0x16   :  { %p670_p8 = scmp.ne.s32.totalorder %s967_s4, %s669_s23  ;;  %p673_p9 = scmp.lt.u32.totalorder %s669_s23, %s967_s4 }
  0x18   :  { %p675_p10 = pnand %p673_p9, %p670_p8 }
  0x1a   :  { %678 = shalt.err (!%p675_p10)
}
  0x1b   :  { %s679_s1 = scalar_lea.vmem %s57_s18, 2048  ;;  %p684_p12 = scmp.lt.s32.totalorder %s57_s18, %s57_s18 }
  0x1c   :  { %p680_p11 = scmp.ne.s32.totalorder %s57_s18, %s679_s1  ;;  %p685_p13 = scmp.lt.s32.totalorder %s679_s1, %s679_s1 }
  0x1e   :  { %p686_p0 = por %p685_p13, %p684_p12 }
  0x20   :  { %p687_p1 = pnand %p686_p0, %p680_p11 }
  0x22   :  { %690 = shalt.err (!%p687_p1)
}
  0x23   :  { %s790_s28 = smov 128   ;;  %s791_s29 = smov 8  }
  0x24   :  { %62 = dma.hbm_to_vmem [thread:$0]  %s967_s4, 2048, %s57_s18, [#allocation9], %s790_s28, %s790_s28, %s791_s29  }
  0x25   :  { %s691_s12 = scalar_lea.hbm %s963_s0, 128 }
  0x26   :  { %p692_p2 = scmp.ne.s32.totalorder %s963_s0, %s691_s12  ;;  %p695_p3 = scmp.lt.u32.totalorder %s691_s12, %s963_s0 }
  0x28   :  { %p697_p4 = pnand %p695_p3, %p692_p2 }
  0x2a   :  { %700 = shalt.err (!%p697_p4)
}
  0x2b   :  { %s701_s17 = scalar_lea.vmem %s24_s20, 128  ;;  %p706_p6 = scmp.lt.s32.totalorder %s24_s20, %s24_s20 }
  0x2c   :  { %p702_p5 = scmp.ne.s32.totalorder %s24_s20, %s701_s17  ;;  %p707_p7 = scmp.lt.s32.totalorder %s701_s17, %s701_s17 }
  0x2e   :  { %p708_p8 = por %p707_p7, %p706_p6 }
  0x30   :  { %p709_p9 = pnand %p708_p8, %p702_p5 }
  0x32   :  { %712 = shalt.err (!%p709_p9)
}
  0x33   :  { %26 = dma.hbm_to_vmem [thread:$0]  %s963_s0, 128, %s24_s20, [#allocation3]  }
  0x34   :  { %s792_s19 = smov [#allocation7]   ;;  %s793_s22 = smov [#allocation10]  }
  0x35   :  { %s42_s21 = sshll.u32 %s792_s19, 4  ;;  %s70_s23 = sshll.u32 %s793_s22, 4  ;;  %s43_s21 = int_to_ptr.vmem [resolvable:$true] %s42_s21  ;;  %s71_s23 = int_to_ptr.vmem [resolvable:$true] %s70_s23 }
  0x36   :  { %s713_s26 = scalar_lea.hbm %s965_s2, 2048 }
  0x37   :  { %p714_p10 = scmp.ne.s32.totalorder %s965_s2, %s713_s26  ;;  %p717_p11 = scmp.lt.u32.totalorder %s713_s26, %s965_s2 }
  0x39   :  { %p719_p12 = pnand %p717_p11, %p714_p10 }
  0x3b   :  { %722 = shalt.err (!%p719_p12)
}
  0x3c   :  { %s723_s0 = scalar_lea.vmem %s43_s21, 2048  ;;  %p728_p0 = scmp.lt.s32.totalorder %s43_s21, %s43_s21 }
  0x3d   :  { %p724_p13 = scmp.ne.s32.totalorder %s43_s21, %s723_s0  ;;  %p729_p1 = scmp.lt.s32.totalorder %s723_s0, %s723_s0 }
  0x3f   :  { %p730_p2 = por %p729_p1, %p728_p0 }
  0x41   :  { %p731_p3 = pnand %p730_p2, %p724_p13 }
  0x43   :  { %734 = shalt.err (!%p731_p3)
}
  0x44   :  { %48 = dma.hbm_to_vmem [thread:$0]  %s965_s2, 2048, %s43_s21, [#allocation6], %s790_s28, %s790_s28, %s791_s29  }
  0x45   :  { %s735_s13 = scalar_lea.hbm %s969_s6, 2048 }
  0x46   :  { %p736_p4 = scmp.ne.s32.totalorder %s969_s6, %s735_s13  ;;  %p739_p5 = scmp.lt.u32.totalorder %s735_s13, %s969_s6 }
  0x48   :  { %p741_p6 = pnand %p739_p5, %p736_p4 }
  0x4a   :  { %744 = shalt.err (!%p741_p6)
}
  0x4b   :  { %s745_s4 = scalar_lea.vmem %s71_s23, 2048  ;;  %p750_p8 = scmp.lt.s32.totalorder %s71_s23, %s71_s23 }
  0x4c   :  { %p746_p7 = scmp.ne.s32.totalorder %s71_s23, %s745_s4  ;;  %p751_p9 = scmp.lt.s32.totalorder %s745_s4, %s745_s4 }
  0x4e   :  { %p752_p10 = por %p751_p9, %p750_p8 }
  0x50   :  { %p753_p11 = pnand %p752_p10, %p746_p7 }
  0x52   :  { %756 = shalt.err (!%p753_p11)
}
  0x53   :  { %76 = dma.hbm_to_vmem [thread:$0]  %s969_s6, 2048, %s71_s23, [#allocation9], %s790_s28, %s790_s28, %s791_s29  }
  0x54   :  { %779 = dma.done.wait [#allocation3], 128  }
  0x55   :  { %780 = vsyncadd [#allocation3], 4294967168 }
  0x56   :  { %781 = dma.done.wait [#allocation6], 2176  }
  0x57   :  { %782 = vsyncadd [#allocation6], 4294965120 }
  0x58   :  { %783 = dma.done.wait [#allocation9], 4096  }
  0x59   :  { %784 = vsyncadd [#allocation9], 4294963200  ;;  %v794_v0 = vmov 0.0|0.0   ;;  %vm795_vm0 = vmmov 0   ;;  %v796_v1 = vmov 0.0   ;;  %v95_v2 = vld [vmem:[#allocation7] sm:$0xff] }
  0x5a   :  { %560 = vmatprep.subr.bf16.mxu0 %v794_v0  ;;  %584 = vmatprep.subr.bf16.mxu1 %v794_v0  ;;  %v96_v3 = vld [vmem:[#allocation7 + $0x8] sm:$0xff]  ;;  %v97_v4 = vld [vmem:[#allocation7 + $0x10] sm:$0xff]  ;;  %v98_v6 = vld [vmem:[#allocation7 + $0x18] sm:$0xff]  ;;  %s797_s22 = smov [#allocation11]  }
  0x5b   :  { %487 = vmatprep.mubr.msk.f32.mxu0 %vm795_vm0, %v796_v1  ;;  %522 = vmatprep.mubr.msk.f32.mxu1 %vm795_vm0, %v796_v1  ;;  %v561_v5 = vpack.c.bf16 %v96_v3, %v95_v2  ;;  %v564_v7 = vpack.c.bf16 %v98_v6, %v97_v4  ;;  %v99_v8 = vld [vmem:[#allocation7 + $0x20] sm:$0xff]  ;;  %v100_v9 = vld [vmem:[#allocation7 + $0x28] sm:$0xff]  ;;  %v114_v13 = vld [vmem:[#allocation8 + $0x10] sm:$0xff]  ;;  %s389_s23 = sshll.u32 %s797_s22, 4  ;;  %s390_s23 = int_to_ptr.vmem [resolvable:$true] %s389_s23 }
  0x5c   :  { %v112_v10 = vld [vmem:[#allocation8] sm:$0xff]  ;;  %v113_v11 = vld [vmem:[#allocation8 + $0x8] sm:$0xff]  ;;  %v115_v14 = vld [vmem:[#allocation8 + $0x18] sm:$0xff]  ;;  %v567_v15 = vpack.c.bf16 %v100_v9, %v99_v8  ;;  %s757_s24 = scalar_lea.vmem %s390_s23, 128  ;;  %p762_p13 = scmp.lt.s32.totalorder %s390_s23, %s390_s23 }
  0x5d   :  { %562 = vmatpush3.bf16.msra.mxu0 %v561_v5  ;;  %v585_v12 = vpack.c.bf16 %v113_v11, %v112_v10  ;;  %v101_v16 = vld [vmem:[#allocation7 + $0x30] sm:$0xff]  ;;  %v102_v17 = vld [vmem:[#allocation7 + $0x38] sm:$0xff]  ;;  %v588_v18 = vpack.c.bf16 %v115_v14, %v114_v13  ;;  %v116_v19 = vld [vmem:[#allocation8 + $0x20] sm:$0xff]  ;;  %p758_p12 = scmp.ne.s32.totalorder %s390_s23, %s757_s24  ;;  %p763_p0 = scmp.lt.s32.totalorder %s757_s24, %s757_s24 }
  0x5e   :  { %563 = vmatprep.subr.bf16.mxu0 %v794_v0  ;;  %v117_v20 = vld [vmem:[#allocation8 + $0x28] sm:$0xff]  ;;  %v570_v21 = vpack.c.bf16 %v102_v17, %v101_v16  ;;  %v103_v22 = vld [vmem:[#allocation7 + $0x40] sm:$0xff]  ;;  %v118_v25 = vld [vmem:[#allocation8 + $0x30] sm:$0xff] }
  0x5f   :  { %586 = vmatpush3.bf16.msra.mxu1 %v585_v12  ;;  %v104_v23 = vld [vmem:[#allocation7 + $0x48] sm:$0xff]  ;;  %v591_v24 = vpack.c.bf16 %v117_v20, %v116_v19  ;;  %v119_v26 = vld [vmem:[#allocation8 + $0x38] sm:$0xff]  ;;  %v105_v28 = vld [vmem:[#allocation7 + $0x50] sm:$0xff]  ;;  %p764_p1 = por %p763_p0, %p762_p13 }
  0x60   :  { %587 = vmatprep.subr.bf16.mxu1 %v794_v0  ;;  %v573_v27 = vpack.c.bf16 %v104_v23, %v103_v22  ;;  %v106_v29 = vld [vmem:[#allocation7 + $0x58] sm:$0xff]  ;;  %v594_v30 = vpack.c.bf16 %v119_v26, %v118_v25  ;;  %v120_v31 = vld [vmem:[#allocation8 + $0x40] sm:$0xff]  ;;  %v121_v32 = vld [vmem:[#allocation8 + $0x48] sm:$0xff] }
  0x61   :  { %565 = vmatpush3.bf16.msra.mxu0 %v564_v7  ;;  %v576_v33 = vpack.c.bf16 %v106_v29, %v105_v28  ;;  %v107_v34 = vld [vmem:[#allocation7 + $0x60] sm:$0xff]  ;;  %v108_v35 = vld [vmem:[#allocation7 + $0x68] sm:$0xff]  ;;  %v597_v36 = vpack.c.bf16 %v121_v32, %v120_v31  ;;  %v122_v37 = vld [vmem:[#allocation8 + $0x50] sm:$0xff]  ;;  %p765_p2 = pnand %p764_p1, %p758_p12 }
  0x62   :  { %566 = vmatprep.subr.bf16.mxu0 %v794_v0  ;;  %v123_v38 = vld [vmem:[#allocation8 + $0x58] sm:$0xff]  ;;  %v579_v39 = vpack.c.bf16 %v108_v35, %v107_v34  ;;  %v109_v40 = vld [vmem:[#allocation7 + $0x70] sm:$0xff]  ;;  %v124_v43 = vld [vmem:[#allocation8 + $0x60] sm:$0xff] }
  0x63   :  { %589 = vmatpush3.bf16.msra.mxu1 %v588_v18  ;;  %v110_v41 = vld [vmem:[#allocation7 + $0x78] sm:$0xff]  ;;  %v600_v42 = vpack.c.bf16 %v123_v38, %v122_v37  ;;  %v125_v44 = vld [vmem:[#allocation8 + $0x68] sm:$0xff]  ;;  %v126_v47 = vld [vmem:[#allocation8 + $0x70] sm:$0xff] }
  0x64   :  { %590 = vmatprep.subr.bf16.mxu1 %v794_v0  ;;  %v582_v45 = vpack.c.bf16 %v110_v41, %v109_v40  ;;  %v603_v46 = vpack.c.bf16 %v125_v44, %v124_v43  ;;  %v127_v48 = vld [vmem:[#allocation8 + $0x78] sm:$0xff]  ;;  %v94_v49 = vld [vmem:[#allocation2] sm:$0xff]  ;;  %v289_v52 = vld [vmem:[#allocation10] sm:$0xff] }
  0x65   :  { %568 = vmatpush3.bf16.msra.mxu0 %v567_v15  ;;  %v606_v50 = vpack.c.bf16 %v127_v48, %v126_v47  ;;  %v111_v51 = vld [vmem:[#allocation5] sm:$0xff]  ;;  %v290_v53 = vld [vmem:[#allocation10 + $0x8] sm:$0xff]  ;;  %v291_v55 = vld [vmem:[#allocation10 + $0x10] sm:$0xff] }
  0x66   :  { %569 = vmatprep.subr.bf16.mxu0 %v794_v0  ;;  %v609_v54 = vpack.c.bf16 %v290_v53, %v289_v52  ;;  %v292_v56 = vld [vmem:[#allocation10 + $0x18] sm:$0xff]  ;;  %v293_v58 = vld [vmem:[#allocation10 + $0x20] sm:$0xff]  ;;  %v294_v59 = vld [vmem:[#allocation10 + $0x28] sm:$0xff] }
  0x67   :  { %592 = vmatpush3.bf16.msra.mxu1 %v591_v24  ;;  %v612_v57 = vpack.c.bf16 %v292_v56, %v291_v55  ;;  %v615_v60 = vpack.c.bf16 %v294_v59, %v293_v58  ;;  %v295_v61 = vld [vmem:[#allocation10 + $0x30] sm:$0xff]  ;;  %v296_v62 = vld [vmem:[#allocation10 + $0x38] sm:$0xff]  ;;  %v298_v2 = vld [vmem:[#allocation10 + $0x48] sm:$0xff] }
  0x68   :  { %593 = vmatprep.subr.bf16.mxu1 %v794_v0  ;;  %v618_v63 = vpack.c.bf16 %v296_v62, %v295_v61  ;;  %v299_v4 = vld [vmem:[#allocation10 + $0x50] sm:$0xff]  ;;  %v300_v5 = vld [vmem:[#allocation10 + $0x58] sm:$0xff]  ;;  %v301_v7 = vld [vmem:[#allocation10 + $0x60] sm:$0xff] }
  0x69   :  { %571 = vmatpush3.bf16.msra.mxu0 %v570_v21  ;;  %v624_v6 = vpack.c.bf16 %v300_v5, %v299_v4  ;;  %v302_v8 = vld [vmem:[#allocation10 + $0x68] sm:$0xff]  ;;  %v303_v10 = vld [vmem:[#allocation10 + $0x70] sm:$0xff]  ;;  %v304_v11 = vld [vmem:[#allocation10 + $0x78] sm:$0xff] }
  0x6a   :  { %572 = vmatprep.subr.bf16.mxu0 %v794_v0  ;;  %v627_v9 = vpack.c.bf16 %v302_v8, %v301_v7  ;;  %v630_v12 = vpack.c.bf16 %v304_v11, %v303_v10  ;;  %v400_v13 = vld [vmem:[%s966_s3] ss:$0 sm:$0xff] }
  0x6b   :  { %595 = vmatpush3.bf16.msra.mxu1 %v594_v30  ;;  %v403_v25 = vld [vmem:[%s970_s7] ss:$0 sm:$0xff] }
  0x6c   :  { %596 = vmatprep.subr.bf16.mxu1 %v794_v0 }
  0x6d   :  { %574 = vmatpush3.bf16.msra.mxu0 %v573_v27 }
  0x6e   :  { %575 = vmatprep.subr.bf16.mxu0 %v794_v0 }
  0x6f   :  { %598 = vmatpush3.bf16.msra.mxu1 %v597_v36 }
  0x70   :  { %599 = vmatprep.subr.bf16.mxu1 %v794_v0 }
  0x71   :  { %577 = vmatpush3.bf16.msra.mxu0 %v576_v33 }
  0x72   :  { %578 = vmatprep.subr.bf16.mxu0 %v794_v0 }
  0x73   :  { %601 = vmatpush3.bf16.msra.mxu1 %v600_v42 }
  0x74   :  { %602 = vmatprep.subr.bf16.mxu1 %v794_v0 }
  0x75   :  { %580 = vmatpush3.bf16.msra.mxu0 %v579_v39 }
  0x76   :  { %581 = vmatprep.subr.bf16.mxu0 %v794_v0 }
  0x77   :  { %604 = vmatpush3.bf16.msra.mxu1 %v603_v46 }
  0x78   :  { %605 = vmatprep.subr.bf16.mxu1 %v794_v0 }
  0x79   :  { %583 = vmatpush3.bf16.msra.mxu0 %v582_v45 }
  0x7a   :  { %608 = vmatprep.subr.bf16.mxu0 %v794_v0 }
  0x7b   :  { %607 = vmatpush3.bf16.msra.mxu1 %v606_v50 }
  0x7c   :  { %488 = vmatmul.mubr.f32.vlgmr.msra.gmra.mrb[0].mxu0 %v94_v49 }
  0x7d   :  { %557 = vmatprep.mubr.msk.f32.mxu0 %vm795_vm0, %v796_v1  ;;  %610 = vmatpush3.bf16.msra.mxu0 %v609_v54  ;;  %v297_v1 = vld [vmem:[#allocation10 + $0x40] sm:$0xff] }
  0x7e   :  { %523 = vmatmul.mubr.f32.vlgmr.msra.gmra.mrb[0].mxu1 %v111_v51  ;;  %611 = vmatprep.subr.bf16.mxu0 %v794_v0  ;;  %v621_v3 = vpack.c.bf16 %v298_v2, %v297_v1 }
  0x81   :  { %613 = vmatpush3.bf16.msra.mxu0 %v612_v57 }
  0x82   :  { %614 = vmatprep.subr.bf16.mxu0 %v794_v0 }
  0x85   :  { %616 = vmatpush3.bf16.msra.mxu0 %v615_v60 }
  0x86   :  { %617 = vmatprep.subr.bf16.mxu0 %v794_v0 }
  0x89   :  { %619 = vmatpush3.bf16.msra.mxu0 %v618_v63 }
  0x8a   :  { %620 = vmatprep.subr.bf16.mxu0 %v794_v0 }
  0x8d   :  { %622 = vmatpush3.bf16.msra.mxu0 %v621_v3 }
  0x8e   :  { %623 = vmatprep.subr.bf16.mxu0 %v794_v0 }
  0x91   :  { %625 = vmatpush3.bf16.msra.mxu0 %v624_v6 }
  0x92   :  { %626 = vmatprep.subr.bf16.mxu0 %v794_v0 }
  0x95   :  { %628 = vmatpush3.bf16.msra.mxu0 %v627_v9 }
  0x96   :  { %629 = vmatprep.subr.bf16.mxu0 %v794_v0  ;;  %v401_v0 = vld [vmem:[%s968_s5] ss:$0 sm:$0xff] }
  0x99   :  { %631 = vmatpush3.bf16.msra.mxu0 %v630_v12 }
 0x14f   :  { %v201_v14 = vpop.f32.mrb[0].mxu0 }
 0x150   :  { %v202_v15 = vadd.f32 %v400_v13, %v201_v14  ;;  %v489_v16 = vpop.f32.mrb[1].mxu0 }
 0x151   :  { %v278_v18 = vpop.f32.mrb[0].mxu1 }
 0x152   :  { %v402_v17 = vmul.f32 -1.442695, %v202_v15  ;;  %v524_v19 = vpop.f32.mrb[1].mxu1  ;;  %v279_v22 = vadd.f32 %v401_v0, %v278_v18 }
 0x154   :  { %643 = vpow2.f32 %v402_v17 }
 0x15e   :  { %v644_v20 = vpop.eup %643 }
 0x15f   :  { %v285_v21 = vadd.f32 1.0, %v644_v20 }
 0x161   :  { %645 = vrcp.f32 %v285_v21 }
 0x16b   :  { %v646_v23 = vpop.eup %645 }
 0x16c   :  { %v288_v24 = vmul.f32 %v646_v23, %v279_v22 }
 0x16e   :  { %558 = vmatmul.mubr.f32.vlgmr.msra.gmra.mrb[2].mxu0 %v288_v24 }
 0x241   :  { %v378_v26 = vpop.f32.mrb[2].mxu0 }
 0x242   :  { %v379_v27 = vadd.f32 %v403_v25, %v378_v26  ;;  %v559_v28 = vpop.f32.mrb[3].mxu0 }
 0x244   :  { %382 = vst [vmem:[#allocation11] sm:$0xff] %v379_v27 }
 0x245   :  { %768 = shalt.err (!%p765_p2)
}
 0x246   :  { %s769_s26 = scalar_lea.hbm %s971_s8, 128 }
 0x247   :  { %p770_p3 = scmp.ne.s32.totalorder %s971_s8, %s769_s26  ;;  %p773_p4 = scmp.lt.u32.totalorder %s769_s26, %s971_s8 }
 0x249   :  { %p775_p5 = pnand %p773_p4, %p770_p3 }
 0x24b   :  { %778 = shalt.err (!%p775_p5)
}
 0x24c   :  { %392 = dma.vmem_to_hbm [thread:$0]  %s390_s23, 128, %s971_s8, [#allocation4]  }
 0x24d   :  { %785 = dma.done.wait [#allocation4], 128  }
 0x24e   :  { %786 = vsyncadd [#allocation4], 4294967168 }
 0x24f   :  { %396 = vsyncpa [#allocation3], 1 }
 0x250   :  { %397 = vsyncpa [#allocation6], 1 }
 0x251   :  { %398 = vsyncpa [#allocation9], 1 }
 0x252   :  { %399 = vsyncpa [#allocation4], 1 }

</bundles_post_ra>
